<compile_context>
chip_gen: v7x
topology: tpu7x:2x2x1
jax: 0.10.0
libtpu: 0.0.40
codegen_flags: <defaults>
</compile_context>

<pallas_src>
import math

import jax
import jax.numpy as jnp
from jax.experimental import pallas as pl
from jax.experimental.pallas import tpu as pltpu


def _lora_kernel_factory(alpha: float):
    """Build the kernel with `alpha` baked in as a compile-time constant."""

    def lora_kernel(x_ref, a_ref, b_ref, o_ref, xa_ref):
        # First out_dim tile for this batch tile: compute and cache
        # xa = alpha * (x_tile @ A) in VMEM scratch (shape (TM, rank), f32).
        @pl.when(pl.program_id(1) == 0)
        def _():
            xa = jnp.dot(x_ref[...], a_ref[...],
                         preferred_element_type=jnp.float32)
            xa_ref[...] = alpha * xa

        # Hot inner loop over out_dim tiles: one small-K (K = rank) MXU matmul
        # producing a lane-dense (TM, TN) output tile.
        o_ref[...] = jnp.dot(xa_ref[...], b_ref[...],
                             preferred_element_type=jnp.float32
                             ).astype(o_ref.dtype)

    return lora_kernel


def _pick_tile(dim: int, preferred: int, granule: int) -> int:
    """Largest tile <= preferred satisfying the (8,128) block rule.

    A block dim is legal if it is a multiple of the hardware granule OR equals
    the full array dim.
    """
    if dim <= preferred:
        return dim
    return max(granule, (preferred // granule) * granule)


def lora_forward(x, A, B, alpha, *, tm: int = 256, tn: int = 512):
    """alpha * (x @ A @ B) as a tiled, pipelined Pallas TPU kernel."""
    batch, in_dim = x.shape
    rank, out_dim = B.shape
    assert A.shape == (in_dim, rank)

    tm = _pick_tile(batch, tm, 8)      # sublane granule (f32)
    tn = _pick_tile(out_dim, tn, 128)  # lane granule -> unmasked stores
    grid = (pl.cdiv(batch, tm), pl.cdiv(out_dim, tn))

    kernel = _lora_kernel_factory(float(alpha))

    itemsize = jnp.dtype(x.dtype).itemsize
    bytes_accessed = (
        batch * in_dim * itemsize                       # x streamed once
        + in_dim * rank * jnp.dtype(A.dtype).itemsize   # A resident
        + rank * out_dim * jnp.dtype(B.dtype).itemsize * grid[0]  # B per i tile
        + batch * out_dim * itemsize                    # output
    )
    cost = pl.CostEstimate(
        flops=2 * batch * rank * (in_dim + out_dim),
        transcendentals=0,
        bytes_accessed=int(bytes_accessed),
    )

    return pl.pallas_call(
        kernel,
        out_shape=jax.ShapeDtypeStruct((batch, out_dim), x.dtype),
        grid_spec=pltpu.PrefetchScalarGridSpec(
            num_scalar_prefetch=0,
            grid=grid,
            in_specs=[
                # x: one (TM, in_dim) tile per batch tile; constant across j.
                pl.BlockSpec((tm, in_dim), lambda i, j: (i, 0)),
                # A: single resident block (rank is the full array dim).
                pl.BlockSpec((in_dim, rank), lambda i, j: (0, 0)),
                # B: (rank, TN) tile streamed along out_dim.
                pl.BlockSpec((rank, tn), lambda i, j: (0, j)),
            ],
            # Lane-dense output tile.
            out_specs=pl.BlockSpec((tm, tn), lambda i, j: (i, j)),
            # Cached alpha * (x @ A) intermediate, persists across j.
            scratch_shapes=[pltpu.VMEM((tm, rank), jnp.float32)],
        ),
        compiler_params=pltpu.CompilerParams(
            # i (batch tiles) is independent -> megacore-shardable.
            # j must be "arbitrary": the xa scratch written at j == 0 is
            # reused by all later j for the same batch tile.
            dimension_semantics=("parallel", "arbitrary"),
            vmem_limit_bytes=64 * 1024 * 1024,
        ),
        cost_estimate=cost,
    )(x, A, B)


def init_lora_params(key, in_dim, rank, out_dim, dtype=jnp.float32):
    """Deterministic init mirroring the PyTorch module's __init__.

    A: kaiming_uniform_(a=sqrt(5)) on a (in_dim, rank) tensor; PyTorch's
       fan_in for that shape is rank (dim 1).
    B: zeros (as in the module).
    """
    a = math.sqrt(5.0)
    fan_in = rank
    gain = math.sqrt(2.0 / (1.0 + a * a))
    bound = gain * math.sqrt(3.0 / fan_in)
    A = jax.random.uniform(key, (in_dim, rank), dtype=dtype,
                           minval=-bound, maxval=bound)
    B = jnp.zeros((rank, out_dim), dtype=dtype)
    return A, B


if __name__ == "__main__":
    # Small but non-trivial shapes: 2x2 grid of (128, 256) output tiles so the
    # pl.when(j == 0) caching and both grid axes are actually exercised.
    batch, in_dim, rank, out_dim = 256, 128, 8, 512
    alpha = 2.0

    key = jax.random.PRNGKey(0)
    k_x, k_a, k_b = jax.random.split(key, 3)

    x = jax.random.normal(k_x, (batch, in_dim), dtype=jnp.float32)
    A, B_zero = init_lora_params(k_a, in_dim, rank, out_dim)
    # Use a random (non-zero) B for the numerical check so the second matmul
    # and the alpha scaling are actually validated; the module-faithful
    # zero-initialized B path is checked separately below.
    B = 0.05 * jax.random.normal(k_b, (rank, out_dim), dtype=jnp.float32)

    out = lora_forward(x, A, B, alpha, tm=128, tn=256)
    out = jax.block_until_ready(out)

    # Reference in plain JAX at highest precision (matches the PyTorch forward).
    xa_ref = jnp.dot(x, A, precision=jax.lax.Precision.HIGHEST)
    ref = alpha * jnp.dot(xa_ref, B, precision=jax.lax.Precision.HIGHEST)
    assert out.shape == (batch, out_dim)
    assert jnp.allclose(out, ref, atol=5e-3, rtol=5e-3)

    # Module default init (B == 0) -> output must be exactly zero.
    out0 = jax.block_until_ready(
        lora_forward(x, A, B_zero, alpha, tm=128, tn=256))
    assert jnp.allclose(out0, jnp.zeros_like(out0))

    print("KERNEL_OK")
</pallas_src>

<mosaic_0001>
module attributes {stable_mosaic.version = 11 : i64} {
  func.func @lora_kernel(%arg0: i32, %arg1: i32, %arg2: memref<128x128xf32, #tpu.memory_space<vmem>>, %arg3: memref<128x8xf32, #tpu.memory_space<vmem>>, %arg4: memref<8x256xf32, #tpu.memory_space<vmem>>, %arg5: memref<128x256xf32, #tpu.memory_space<vmem>>, %arg6: memref<128x8xf32, #tpu.memory_space<vmem>>) attributes {dimension_semantics = [#tpu.dimension_semantics<parallel>, #tpu.dimension_semantics<arbitrary>], iteration_bounds = array<i64: 2, 2>, scalar_prefetch = 0 : i64, scratch_operands = 1 : i64, tpu.core_type = #tpu.core_type<tc>, window_params = [{transform_indices = @transform_0, window_bounds = array<i64: 128, 128>}, {pipeline_mode = #tpu.pipeline_mode<synchronous>, transform_indices = @transform_1, window_bounds = array<i64: 128, 8>}, {transform_indices = @transform_2, window_bounds = array<i64: 8, 256>}, {transform_indices = @transform_3, window_bounds = array<i64: 128, 256>}]} {
    %c0_i32 = arith.constant 0 : i32
    %0 = arith.cmpi eq, %arg1, %c0_i32 : i32
    %1 = arith.extui %0 : i1 to i32
    %c0_i32_0 = arith.constant 0 : i32
    %2 = arith.cmpi ne, %1, %c0_i32_0 : i32
    scf.if %2 {
      %c0_6 = arith.constant 0 : index
      %c0_7 = arith.constant 0 : index
      %7 = vector.load %arg2[%c0_6, %c0_7] : memref<128x128xf32, #tpu.memory_space<vmem>>, vector<128x128xf32>
      %c0_8 = arith.constant 0 : index
      %c0_9 = arith.constant 0 : index
      %8 = vector.load %arg3[%c0_8, %c0_9] : memref<128x8xf32, #tpu.memory_space<vmem>>, vector<128x8xf32>
      %cst_10 = arith.constant dense<0.000000e+00> : vector<128x8xf32>
      %9 = tpu.matmul %7, %8, %cst_10 {dimension_numbers = #tpu.dot_dimension_numbers<[1], [0], [0], [1], [0, 0, 1, 1], [], []>} : vector<128x128xf32>, vector<128x8xf32>, vector<128x8xf32> -> vector<128x8xf32>
      %cst_11 = arith.constant 2.000000e+00 : f32
      %10 = vector.broadcast %cst_11 : f32 to vector<128x8xf32>
      %11 = arith.mulf %10, %9 : vector<128x8xf32>
      %c0_12 = arith.constant 0 : index
      %c0_13 = arith.constant 0 : index
      %12 = vector.load %arg6[%c0_12, %c0_13] : memref<128x8xf32, #tpu.memory_space<vmem>>, vector<128x8xf32>
      tpu.vector_store %arg6[%c0_12, %c0_13], %11 {strides = array<i32>} : memref<128x8xf32, #tpu.memory_space<vmem>>, vector<128x8xf32>,
    } else {
    }
    %c0 = arith.constant 0 : index
    %c0_1 = arith.constant 0 : index
    %3 = vector.load %arg6[%c0, %c0_1] : memref<128x8xf32, #tpu.memory_space<vmem>>, vector<128x8xf32>
    %c0_2 = arith.constant 0 : index
    %c0_3 = arith.constant 0 : index
    %4 = vector.load %arg4[%c0_2, %c0_3] : memref<8x256xf32, #tpu.memory_space<vmem>>, vector<8x256xf32>
    %cst = arith.constant dense<0.000000e+00> : vector<128x256xf32>
    %5 = tpu.matmul %3, %4, %cst {dimension_numbers = #tpu.dot_dimension_numbers<[1], [0], [0], [1], [0, 0, 1, 1], [], []>} : vector<128x8xf32>, vector<8x256xf32>, vector<128x256xf32> -> vector<128x256xf32>
    %c0_4 = arith.constant 0 : index
    %c0_5 = arith.constant 0 : index
    %6 = vector.load %arg5[%c0_4, %c0_5] : memref<128x256xf32, #tpu.memory_space<vmem>>, vector<128x256xf32>
    tpu.vector_store %arg5[%c0_4, %c0_5], %5 {strides = array<i32>} : memref<128x256xf32, #tpu.memory_space<vmem>>, vector<128x256xf32>,
    return
  }
  func.func @transform_0(%arg0: i32, %arg1: i32) -> (i32, i32) {
    %c0_i32 = arith.constant 0 : i32
    %c0_i32_0 = arith.constant 0 : i32
    return %arg0, %c0_i32 : i32, i32
  }
  func.func @transform_1(%arg0: i32, %arg1: i32) -> (i32, i32) {
    %c0_i32 = arith.constant 0 : i32
    %c0_i32_0 = arith.constant 0 : i32
    %c0_i32_1 = arith.constant 0 : i32
    return %c0_i32, %c0_i32_0 : i32, i32
  }
  func.func @transform_2(%arg0: i32, %arg1: i32) -> (i32, i32) {
    %c0_i32 = arith.constant 0 : i32
    %c0_i32_0 = arith.constant 0 : i32
    return %c0_i32, %arg1 : i32, i32
  }
  func.func @transform_3(%arg0: i32, %arg1: i32) -> (i32, i32) {
    %c0_i32 = arith.constant 0 : i32
    return %arg0, %arg1 : i32, i32
  }
}

</mosaic_0001>

<bundles_post_ra>
// kernel: tpu_custom_call.1
= control target key start
LH: loop header
LB: loop body
LE: loop exit
PB: predicated region body
PF: predicated region fallthrough
CT: control target
= control target key end

     0   :  { %s1936_s0 = inlined_call_operand.hbm [shape: f32[256,128], index: 0, kind: input, shape index: {}]   ;;  %s1937_s1 = inlined_call_operand.hbm [shape: f32[128,8], index: 1, kind: input, shape index: {}]   ;;  %s1938_s2 = inlined_call_operand.hbm [shape: f32[8,512], index: 2, kind: input, shape index: {}]   ;;  %s1939_s3 = inlined_call_operand.hbm [shape: f32[256,512], index: 3, kind: output, shape index: {}]  }
   0x1   :  { %1957 = sst [smem:[#allocation22_spill]] %s1936_s0 }
   0x2   :  { %1958 = sst [smem:[#allocation23_spill]] %s1937_s1 }
   0x3   :  { %1959 = sst [smem:[#allocation24_spill]] %s1939_s3 }
   0x4   :  { %8 = vsyncpa [#allocation4], 0 }
   0x5   :  { %10 = vsyncpa [#allocation4 + $0x1], 0 }
   0x6   :  { %11 = vsyncpa [#allocation7], 0 }
   0x7   :  { %12 = vsyncpa [#allocation5], 0 }
   0x8   :  { %14 = vsyncpa [#allocation5 + $0x1], 0  ;;  %s1468_s12 = smov 0   ;;  %s1470_s13 = smov 0  }
   0x9   :  { %s1472_s14 = smov 0   ;;  %s1474_s15 = smov 0  }
   0xa   :  { %s1476_s16 = smov 0   ;;  %s1478_s17 = smov 0  }
   0xb   :  { %s1480_s18 = smov 0   ;;  %s1482_s19 = smov 0  }
   0xc   :  { %s1484_s20 = smov 0   ;;  %s1486_s21 = smov 0  }
   0xd   :  { %s1488_s22 = smov 0   ;;  %s1490_s23 = smov 0  }
   0xe   :  { %s1492_s24 = smov 0   ;;  %s1494_s25 = smov 0  }
   0xf LB: > { %1960 = sst [smem:[#allocation14_spill]] %s1384_s12  ;;  %p46_p0 = scmp.ne.s32.totalorder %s1416_s20, %s1412_s19  ;;  %s1436_s25 = sphi %s1494_s25, %s20_s25   ;;  %s1432_s24 = sphi %s1492_s24, %s2019_s24   ;;  %s1428_s23 = sphi %s1490_s23, %s2018_s23   ;;  %s1424_s22 = sphi %s1488_s22, %s2017_s22   ;;  %s1420_s21 = sphi %s1486_s21, %s2016_s21   ;;  %s1416_s20 = sphi %s1484_s20, %s2015_s20   ;;  %s1412_s19 = sphi %s1482_s19, %s2014_s19   ;;  %s1408_s18 = sphi %s1480_s18, %s2013_s18   ;;  %s1404_s17 = sphi %s1478_s17, %s2012_s17   ;;  %s1400_s16 = sphi %s1476_s16, %s2011_s16   ;;  %s1396_s15 = sphi %s1474_s15, %s2010_s15   ;;  %s1392_s14 = sphi %s1472_s14, %s2009_s14   ;;  %s1388_s13 = sphi %s1470_s13, %s2008_s13   ;;  %s1384_s12 = sphi %s1468_s12, %s2007_s12  }
  0x10   : > { %1961 = sst [smem:[#allocation15_spill]] %s1388_s13  ;;  %p1945_p1 = scmp.eq.s32.totalorder %s1436_s25, 0 }
  0x11   : > { %1962 = sst [smem:[#allocation16_spill]] %s1420_s21  ;;  %p1940_p3 = scmp.lt.s32.totalorder %s1436_s25, 4 }
  0x12   : > { %1963 = sst [smem:[#allocation17_spill]] %s1424_s22  ;;  %p48_p2 = por %p1945_p1, %p46_p0 }
  0x13   : > { %s164_s28 = sand.u32 1, %s1436_s25   ;;  %s166_s29 = sand.u32 1, %s1416_s20  }
  0x14   : > { %s870_s30 = sshll.u32 %s166_s29, 7  ;;  %s905_s4 = sshll.u32 %s1432_s24, 11 }
  0x15   : > { %s1964_s0 = sld [smem:[#allocation22_spill]]  ;;  %s168_s8 = scalar_lea.vmem [#allocation3], %s870_s30 }
  0x16   : > { %s175_s9 = sshll.u32 %s168_s8, 4  ;;  %p1556_p4 = pnand %p1940_p3, %p48_p2  ;;  %s1560_s9 = int_to_ptr.vmem [resolvable:$true] %s175_s9 }
  0x17   : > { %s1562_s11 = scalar_lea.sflag [#allocation4], %s164_s28 }
  0x18   : > { %p1196_p6 = pneg %p1556_p4 }
  0x1b   : > { %s1552_s7 = scalar_lea.hbm %s1964_s0, %s905_s4  ;;  %s1199_s5 = scalar_lea.hbm %s1964_s0, 4096 }
  0x1c   : > { %s1194_s29 = scalar_lea.hbm %s1552_s7, 2048  ;;  %p1200_p9 = scmp.lt.u32.totalorder %s1552_s7, %s1964_s0 }
  0x1d   : > { %p1195_p5 = scmp.ne.s32.totalorder %s1552_s7, %s1194_s29  ;;  %p1201_p10 = scmp.lt.u32.totalorder %s1199_s5, %s1194_s29 }
  0x1e   : > { %p1203_p12 = scmp.lt.u32.totalorder %s1194_s29, %s1552_s7 }
  0x1f   : > { %p1197_p7 = pnand %p1196_p6, %p1195_p5  ;;  %p1202_p11 = por %p1201_p10, %p1200_p9 }
  0x21   : > { %p1198_p8 = pneg %p1197_p7  ;;  %p1204_p13 = por %p1203_p12, %p1202_p11 }
  0x23   : > { %p1205_p0 = pnand %p1204_p13, %p1198_p8 }
  0x25   : > { %1208 = shalt.err (!%p1205_p0)
}
  0x26   : > { %s1209_s28 = scalar_lea.vmem %s1560_s9, 2048  ;;  %s1438_s30 = smov [#allocation3]  }
  0x27   : > { %p1210_p2 = scmp.ne.s32.totalorder %s1560_s9, %s1209_s28  ;;  %s1214_s4 = sshll.u32 %s1438_s30, 4  ;;  %s1215_s4 = int_to_ptr.vmem [resolvable:$false] %s1214_s4 }
  0x28   : > { %s1216_s6 = scalar_lea.vmem %s1215_s4, 4096  ;;  %p1217_p3 = scmp.lt.s32.totalorder %s1560_s9, %s1215_s4 }
  0x29   : > { %p1212_p5 = pnand %p1210_p2, %p1196_p6  ;;  %p1218_p9 = scmp.lt.s32.totalorder %s1216_s6, %s1209_s28 }
  0x2b   : > { %p1213_p7 = pneg %p1212_p5  ;;  %p1219_p10 = por %p1218_p9, %p1217_p3 }
  0x2d   : > { %p1220_p11 = pnand %p1219_p10, %p1213_p7 }
  0x2f   : > { %1223 = shalt.err (!%p1220_p11)
}
  0x30   : > { %s1941_s29 = smov 128   ;;  %s1942_s5 = smov 8  }
  0x31   : > { %1063 = dma.hbm_to_vmem [thread:$0]  (!%p1556_p4), %s1552_s7, 2048, %s1560_s9, %s1562_s11, %s1941_s29, %s1941_s29, %s1942_s5  }
  0x32   : > { %s1594_s8 = sadd.s32 4294967295, %s1436_s25   ;;  %s866_s28 = sadd.s32 4294967294, %s1436_s25  }
  0x33   : > { %p52_p3 = scmp.ne.s32.totalorder %s1412_s19, %s1408_s18  ;;  %p1944_p6 = scmp.eq.s32.totalorder %s1594_s8, 0 }
  0x34   : > { %p124_p8 = scmp.ne.s32.totalorder %s1392_s14, %s1388_s13  ;;  %p125_p12 = scmp.eq.s32.totalorder %s1594_s8, 3 }
  0x35   : > { %p1605_p13 = por %p1944_p6, %p52_p3  ;;  %p130_p0 = scmp.ne.s32.totalorder %s1388_s13, %s1384_s12 }
  0x36   : > { %p1611_p2 = por %p125_p12, %p124_p8  ;;  %p131_p4 = scmp.eq.s32.totalorder %s866_s28, 3 }
  0x37   : > { %s1966_s30 = scalar_select %p1605_p13, 1, 0 }
  0x38   : > { %s1967_s10 = scalar_select %p1611_p2, 1, 0 }
  0x39   : > { %p867_p5 = scmp.ge.s32.totalorder %s1436_s25, 1  ;;  %p138_p7 = scmp.lt.s32.totalorder %s1436_s25, 5 }
  0x3a   : > { %1968 = sst [smem:[#allocation18_spill]] %s1967_s10  ;;  %p1617_p9 = por %p131_p4, %p130_p0 }
  0x3b   : > { %p1621_p10 = pnand %p867_p5, %p138_p7  ;;  %s1441_s9 = smov [#allocation6]  }
  0x3c   : > { %s1969_s7 = scalar_select %p1617_p9, 1, 0 }
  0x3d   : > { %s1971_s18 = scalar_select %p1621_p10, 1, 0 }
  0x3e   : > { %1970 = sst [smem:[#allocation19_spill]] %s1969_s7  ;;  %s150_s4 = sshll.u32 %s1441_s9, 4  ;;  %s151_s4 = int_to_ptr.vmem [resolvable:$true] %s150_s4 }
  0x3f   : > { %p1056_p11 = pneg %p1621_p10  ;;  %s1973_s1 = sld [smem:[#allocation23_spill]] }
  0x41   : > { %p1629_p3 = pnand %p1056_p11, %p1944_p6 }
  0x43   : > { %p1226_p12 = pneg %p1629_p3 }
  0x45   : > { %s1224_s26 = scalar_lea.hbm %s1973_s1, 2048 }
  0x46   : > { %p1225_p8 = scmp.ne.s32.totalorder %s1973_s1, %s1224_s26  ;;  %p1231_p5 = scmp.lt.u32.totalorder %s1224_s26, %s1973_s1 }
  0x48   : > { %p1227_p0 = pnand %p1226_p12, %p1225_p8 }
  0x4a   : > { %p1228_p4 = pneg %p1227_p0 }
  0x4c   : > { %p1233_p7 = pnand %p1231_p5, %p1228_p4 }
  0x4e   : > { %1236 = shalt.err (!%p1233_p7)
}
  0x4f   : > { %s1237_s7 = scalar_lea.vmem %s151_s4, 2048  ;;  %p1245_p9 = scmp.lt.s32.totalorder %s151_s4, %s151_s4 }
  0x50   : > { %p1238_p11 = scmp.ne.s32.totalorder %s151_s4, %s1237_s7  ;;  %p1246_p2 = scmp.lt.s32.totalorder %s1237_s7, %s1237_s7 }
  0x52   : > { %p1240_p6 = pnand %p1238_p11, %p1226_p12  ;;  %p1247_p13 = por %p1246_p2, %p1245_p9 }
  0x54   : > { %p1241_p1 = pneg %p1240_p6 }
  0x56   : > { %p1248_p10 = pnand %p1247_p13, %p1241_p1 }
  0x58   : > { %1251 = shalt.err (!%p1248_p10)
}
  0x59   : > { %s1974_s27 = smov 8   ;;  %s1975_s29 = smov 128  }
  0x5a   : > { %1059 = dma.hbm_to_vmem [thread:$0]  (!%p1629_p3), %s1973_s1, 2048, %s151_s4, [#allocation7], %s1975_s29, %s1975_s29, %s1974_s27  }
  0x5b   : > { %s29_s0 = sadd.s32 1, %s1428_s23  ;;  %s86_s26 = sadd.s32 1, %s1404_s17 }
  0x5c   : > { %p30_p1 = scmp.ge.s32.totalorder %s29_s0, 2  ;;  %p93_p6 = scmp.ne.s32.totalorder %s1404_s17, %s1400_s16 }
  0x5d   : > { %p99_p13 = scmp.ne.s32.totalorder %s1400_s16, %s1396_s15  ;;  %s1977_s7 = sadd.s32 1, %s1432_s24 }
  0x5e   : > { %s2021_s0 = smov (%p30_p1, %s29_s0), 0  ;;  %s2023_s7 = smov (!%p30_p1, %s1977_s7), %s1432_s24 }
  0x5f   : > { %1976 = sst [smem:[#allocation20_spill]] %s2021_s0  ;;  %s83_s6 = ssub.s32 %s1428_s23, %s2021_s0 }
  0x60   : > { %p1978_p2 = scmp.eq.s32.totalorder %s1436_s25, 0  ;;  %p34_p10 = scmp.ge.s32.totalorder %s2023_s7, 2 }
  0x61   : > { %p84_p3 = scmp.eq.s32.totalorder %s83_s6, 0  ;;  %p1980_p8 = scmp.eq.s32.totalorder %s1594_s8, 0 }
  0x62   : > { %p1667_p9 = por %p93_p6, %p1978_p2  ;;  %s114_s9 = sadd.s32 1, %s1392_s14 }
  0x63   : > { %p1673_p12 = por %p99_p13, %p1980_p8  ;;  %s2025_s7 = smov (%p34_p10, %s2023_s7), 0 }
  0x64   : > { %1982 = sst [smem:[#allocation21_spill]] %s2025_s7  ;;  %s36_s29 = ssub.s32 %s1432_s24, %s2025_s7 }
  0x65   : > { %s1681_s27 = scalar_select %p84_p3, %s1404_s17, %s86_s26  }
  0x66   : > { %s187_s5 = sand.u32 1, %s1404_s17   ;;  %p37_p0 = scmp.eq.s32.totalorder %s36_s29, 0 }
  0x67   : > { %s111_s28 = sor.u32 %s83_s6, %s36_s29  ;;  %s873_s1 = sshll.u32 %s187_s5, 4 }
  0x68   : > { %p112_p4 = scmp.eq.s32.totalorder %s111_s28, 0  ;;  %s1983_s0 = sadd.s32 1, %s1416_s20 }
  0x69   : > { %s1689_s12 = scalar_select %p37_p0, %s1416_s20, %s1983_s0  }
  0x6a   : > { %s1692_s3 = scalar_select %p112_p4, %s1392_s14, %s114_s9  }
  0x6b   : > { %s906_s10 = sshll.u32 %s1428_s23, 8  ;;  %s189_s26 = scalar_lea.vmem [#allocation8], %s873_s1 }
  0x6c   : > { %s1698_s13 = scalar_lea.hbm %s1938_s2, %s906_s10  ;;  %s197_s7 = sshll.u32 %s189_s26, 4  ;;  %s1700_s7 = int_to_ptr.vmem [resolvable:$true] %s197_s7 }
  0x6d   : > { %p1984_p5 = scmp.lt.s32.totalorder %s1436_s25, 4  ;;  %s1252_s6 = scalar_lea.hbm %s1698_s13, 256 }
  0x6e   : > { %p1253_p11 = scmp.ne.s32.totalorder %s1698_s13, %s1252_s6  ;;  %s1257_s22 = scalar_lea.hbm %s1938_s2, 512 }
  0x6f   : > { %p1706_p7 = pnand %p1984_p5, %p1667_p9  ;;  %p1258_p2 = scmp.lt.u32.totalorder %s1698_s13, %s1938_s2 }
  0x70   : > { %p1259_p9 = scmp.lt.u32.totalorder %s1257_s22, %s1252_s6  ;;  %p1261_p3 = scmp.lt.u32.totalorder %s1252_s6, %s1698_s13 }
  0x71   : > { %p1254_p1 = pneg %p1706_p7 }
  0x72   : > { %p1260_p10 = por %p1259_p9, %p1258_p2 }
  0x73   : > { %p1255_p6 = pnand %p1254_p1, %p1253_p11 }
  0x74   : > { %p1262_p8 = por %p1261_p3, %p1260_p10 }
  0x75   : > { %p1256_p13 = pneg %p1255_p6 }
  0x77   : > { %p1263_p0 = pnand %p1262_p8, %p1256_p13 }
  0x79   : > { %1266 = shalt.err (!%p1263_p0)
}
  0x7a   : > { %s1267_s9 = scalar_lea.vmem %s1700_s7, 256  ;;  %s1442_s29 = smov [#allocation8]  }
  0x7b   : > { %p1268_p4 = scmp.ne.s32.totalorder %s1700_s7, %s1267_s9  ;;  %s1272_s5 = sshll.u32 %s1442_s29, 4  ;;  %s1273_s5 = int_to_ptr.vmem [resolvable:$false] %s1272_s5 }
  0x7c   : > { %s1274_s28 = scalar_lea.vmem %s1273_s5, 512  ;;  %p1275_p6 = scmp.lt.s32.totalorder %s1700_s7, %s1273_s5 }
  0x7d   : > { %p1270_p5 = pnand %p1268_p4, %p1254_p1  ;;  %p1276_p2 = scmp.lt.s32.totalorder %s1274_s28, %s1267_s9 }
  0x7f   : > { %p1271_p11 = pneg %p1270_p5  ;;  %p1277_p9 = por %p1276_p2, %p1275_p6 }
  0x81   : > { %p1278_p10 = pnand %p1277_p9, %p1271_p11 }
  0x83   : > { %1281 = shalt.err (!%p1278_p10)
}
  0x84   : > { %1066 = dma.hbm_to_vmem [thread:$0]  (!%p1706_p7), %s1698_s13, 256, %s1700_s7, %s1562_s11  }
  0x85   : > { %p1986_p13 = scmp.ne.s32.totalorder %s1971_s18, 0 }
  0x86   : > { %s208_s26 = sand.u32 (!%p1986_p13), 1, %s1594_s8   ;;  %s210_s6 = sand.u32 (!%p1986_p13), 1, %s1412_s19  }
  0x87   : > { %206 = sbr.rel (%p1986_p13) target bundleno = 681 (0x2a9), region = 32  ;;  %s877_s1 = sshll.u32 (!%p1986_p13), %s210_s6, 7 }
  0x88   : > { %s209_s21 = scalar_lea.sflag (!%p1986_p13), [#allocation4], %s208_s26  ;;  %s1740_s22 = scalar_lea.vmem (!%p1986_p13), [#allocation3], %s877_s1 }
  0x89   : > { %p1987_p1 = scmp.ne.s32.totalorder (!%p1986_p13), %s1966_s30, 0 }
  0x8e   : > { %1367 = dma.done.wait (%p1987_p1), %s209_s21, 2048  }
  0x8f   : > { %1369 = vsyncadd (%p1987_p1), %s209_s21, 4294965248  ;;  %p1988_p3 = scmp.eq.s32.totalorder %s1594_s8, 0 }
  0x91   : > { %1371 = dma.done.wait (%p1988_p3), [#allocation7], 2048   ;;  %p1989_p7 = pmov %p1988_p3 }
  0x92   : > { %s223_s13 = sand.u32 1, %s1400_s16  }
  0x93   : > { %1373 = vsyncadd (%p1989_p7), [#allocation7], 4294965248  ;;  %s1751_s11 = sshll.u32 %s223_s13, 4 }
  0x94   : > { %s225_s18 = scalar_lea.vmem [#allocation8], %s1751_s11 }
  0x95   : > { %1375 = dma.done.wait (%p1673_p12), %s209_s21, 256  }
  0x96   : > { %1377 = vsyncadd (%p1673_p12), %s209_s21, 4294967040  ;;  %s1990_s30 = sld [smem:[#allocation15_spill]]  ;;  %s1991_s8 = sld [smem:[#allocation16_spill]] }
  0x9c   : > { %s250_s7 = sand.u32 1, %s1990_s30   ;;  %p881_p8 = scmp.ne.s32.totalorder %s1991_s8, 0 }
  0x9d   : > { %s880_s0 = sshll.u32 %s250_s7, 8  ;;  %v277_v0 = vld [vmem:[#allocation6] sm:$0xff] (!%p881_p8)  ;;  %v278_v1 = vld [vmem:[#allocation6 + $0x8] sm:$0xff] (!%p881_p8)  ;;  %v279_v2 = vld [vmem:[#allocation6 + $0x10] sm:$0xff] (!%p881_p8)  ;;  %vm454_vm0 = vcmask (!%p881_p8), 64512  }
  0x9e   : > { %s1761_s10 = scalar_lea.vmem [#allocation9], %s880_s0  ;;  %260 = sbr.rel (%p881_p8) target bundleno = 420 (0x1a4), region = 48  ;;  %v996_v3 = vpack.c.bf16 (!%p881_p8), %v278_v1, %v277_v0  ;;  %v280_v4 = vld [vmem:[#allocation6 + $0x18] sm:$0xff] (!%p881_p8)  ;;  %v281_v6 = vld [vmem:[#allocation6 + $0x20] sm:$0xff] (!%p881_p8)  ;;  %v282_v7 = vld [vmem:[#allocation6 + $0x28] sm:$0xff] (!%p881_p8) }
  0x9f   : > { %v1000_v5 = vpack.c.bf16 (!%p881_p8), %v280_v4, %v279_v2  ;;  %v1004_v8 = vpack.c.bf16 (!%p881_p8), %v282_v7, %v281_v6  ;;  %v261_v9 = vld [vmem:[%s1740_s22] sm:$0xff] (!%p881_p8)  ;;  %v283_v11 = vld [vmem:[#allocation6 + $0x30] sm:$0xff] (!%p881_p8)  ;;  %v284_v12 = vld [vmem:[#allocation6 + $0x38] sm:$0xff] (!%p881_p8) }
  0xa0   : > { %997 = vmatprep.subr.bf16.mxu0 (!%p881_p8), %v996_v3  ;;  %1028 = vmatprep.subr.bf16.mxu1 (!%p881_p8), %v996_v3  ;;  %v269_v10 = vld [vmem:[%s1740_s22 + $0x40] sm:$0xff] (!%p881_p8)  ;;  %v1008_v13 = vpack.c.bf16 (!%p881_p8), %v284_v12, %v283_v11  ;;  %v286_v15 = vld [vmem:[#allocation6 + $0x48] sm:$0xff] (!%p881_p8)  ;;  %v287_v17 = vld [vmem:[#allocation6 + $0x50] sm:$0xff] (!%p881_p8) }
  0xa1   : > { %999 = vmatpush3.bf16.msra.mxu0 (!%p881_p8), %v996_v3  ;;  %1036 = vmatpush3.bf16.msra.mxu1 (!%p881_p8), %v996_v3  ;;  %v285_v14 = vld [vmem:[#allocation6 + $0x40] sm:$0xff] (!%p881_p8)  ;;  %v288_v18 = vld [vmem:[#allocation6 + $0x58] sm:$0xff] (!%p881_p8)  ;;  %v290_v21 = vld [vmem:[#allocation6 + $0x68] sm:$0xff] (!%p881_p8) }
  0xa2   : > { %1001 = vmatprep.subr.bf16.mxu0 (!%p881_p8), %v1000_v5  ;;  %1029 = vmatprep.subr.bf16.mxu1 (!%p881_p8), %v1000_v5  ;;  %v1012_v16 = vpack.c.bf16 (!%p881_p8), %v286_v15, %v285_v14  ;;  %v1016_v19 = vpack.c.bf16 (!%p881_p8), %v288_v18, %v287_v17  ;;  %v289_v20 = vld [vmem:[#allocation6 + $0x60] sm:$0xff] (!%p881_p8)  ;;  %v291_v23 = vld [vmem:[#allocation6 + $0x70] sm:$0xff] (!%p881_p8)  ;;  %v292_v24 = vld [vmem:[#allocation6 + $0x78] sm:$0xff] (!%p881_p8) }
  0xa3   : > { %972 = vmatprep.mubr.f32.mxu0 (!%p881_p8), %v261_v9  ;;  %984 = vmatprep.mubr.f32.mxu1 (!%p881_p8), %v269_v10  ;;  %v1020_v22 = vpack.c.bf16 (!%p881_p8), %v290_v21, %v289_v20  ;;  %v1024_v25 = vpack.c.bf16 (!%p881_p8), %v292_v24, %v291_v23  ;;  %v262_v26 = vld [vmem:[%s1740_s22 + $0x8] sm:$0xff] (!%p881_p8)  ;;  %v263_v28 = vld [vmem:[%s1740_s22 + $0x10] sm:$0xff] (!%p881_p8)  ;;  %v264_v30 = vld [vmem:[%s1740_s22 + $0x18] sm:$0xff] (!%p881_p8) }
  0xa4   : > { %v270_v27 = vld [vmem:[%s1740_s22 + $0x48] sm:$0xff] (!%p881_p8)  ;;  %v271_v29 = vld [vmem:[%s1740_s22 + $0x50] sm:$0xff] (!%p881_p8)  ;;  %v272_v31 = vld [vmem:[%s1740_s22 + $0x58] sm:$0xff] (!%p881_p8) }
  0xa5   : > { %1003 = vmatpush3.bf16.msra.mxu0 %v1000_v5  ;;  %1037 = vmatpush3.bf16.msra.mxu1 %v1000_v5  ;;  %v265_v32 = vld [vmem:[%s1740_s22 + $0x20] sm:$0xff]  ;;  %v266_v34 = vld [vmem:[%s1740_s22 + $0x28] sm:$0xff]  ;;  %v267_v36 = vld [vmem:[%s1740_s22 + $0x30] sm:$0xff] }
  0xa6   : > { %1005 = vmatprep.subr.bf16.mxu0 %v1004_v8  ;;  %1030 = vmatprep.subr.bf16.mxu1 %v1004_v8  ;;  %v273_v33 = vld [vmem:[%s1740_s22 + $0x60] sm:$0xff]  ;;  %v274_v35 = vld [vmem:[%s1740_s22 + $0x68] sm:$0xff]  ;;  %v275_v37 = vld [vmem:[%s1740_s22 + $0x70] sm:$0xff] }
  0xa7   : > { %v268_v38 = vld [vmem:[%s1740_s22 + $0x38] sm:$0xff] }
  0xa8   : > { %v276_v39 = vld [vmem:[%s1740_s22 + $0x78] sm:$0xff] }
  0xa9   : > { %1007 = vmatpush3.bf16.msra.mxu0 %v1004_v8  ;;  %1038 = vmatpush3.bf16.msra.mxu1 %v1004_v8 }
  0xaa   : > { %1009 = vmatprep.subr.bf16.mxu0 %v1008_v13  ;;  %1031 = vmatprep.subr.bf16.mxu1 %v1008_v13 }
  0xad   : > { %1011 = vmatpush3.bf16.msra.mxu0 %v1008_v13  ;;  %1039 = vmatpush3.bf16.msra.mxu1 %v1008_v13 }
  0xae   : > { %1013 = vmatprep.subr.bf16.mxu0 %v1012_v16  ;;  %1032 = vmatprep.subr.bf16.mxu1 %v1012_v16 }
  0xb1   : > { %1015 = vmatpush3.bf16.msra.mxu0 %v1012_v16  ;;  %1040 = vmatpush3.bf16.msra.mxu1 %v1012_v16 }
  0xb2   : > { %1017 = vmatprep.subr.bf16.mxu0 %v1016_v19  ;;  %1033 = vmatprep.subr.bf16.mxu1 %v1016_v19 }
  0xb5   : > { %1019 = vmatpush3.bf16.msra.mxu0 %v1016_v19  ;;  %1041 = vmatpush3.bf16.msra.mxu1 %v1016_v19 }
  0xb6   : > { %1021 = vmatprep.subr.bf16.mxu0 %v1020_v22  ;;  %1034 = vmatprep.subr.bf16.mxu1 %v1020_v22 }
  0xb9   : > { %1023 = vmatpush3.bf16.msra.mxu0 %v1020_v22  ;;  %1042 = vmatpush3.bf16.msra.mxu1 %v1020_v22 }
  0xba   : > { %1025 = vmatprep.subr.bf16.mxu0 %v1024_v25  ;;  %1035 = vmatprep.subr.bf16.mxu1 %v1024_v25 }
  0xbd   : > { %1027 = vmatpush3.bf16.msra.mxu0 %v1024_v25  ;;  %1043 = vmatpush3.bf16.msra.mxu1 %v1024_v25 }
  0xc0   : > { %973 = vmatmul.mubr.f32.vlgmr.msra.gmra.mrb[0].mxu0 %v262_v26  ;;  %985 = vmatmul.mubr.f32.vlgmr.msra.gmra.mrb[0].mxu1 %v270_v27 }
  0xc1   : > { %975 = vmatprep.mubr.f32.mxu0 %v263_v28  ;;  %987 = vmatprep.mubr.f32.mxu1 %v271_v29 }
  0xc4   : > { %976 = vmatmul.mubr.f32.gmra.mrb[2].mxu0 %v264_v30  ;;  %988 = vmatmul.mubr.f32.gmra.mrb[2].mxu1 %v272_v31 }
  0xc5   : > { %978 = vmatprep.mubr.f32.mxu0 %v265_v32  ;;  %990 = vmatprep.mubr.f32.mxu1 %v273_v33 }
  0xc8   : > { %979 = vmatmul.mubr.f32.gmra.mrb[4].mxu0 %v266_v34  ;;  %991 = vmatmul.mubr.f32.gmra.mrb[4].mxu1 %v274_v35 }
  0xc9   : > { %981 = vmatprep.mubr.f32.mxu0 %v267_v36  ;;  %993 = vmatprep.mubr.f32.mxu1 %v275_v37 }
  0xcc   : > { %982 = vmatmul.mubr.f32.gmra.mrb[6].mxu0 %v268_v38  ;;  %994 = vmatmul.mubr.f32.gmra.mrb[6].mxu1 %v276_v39 }
 0x193   : > { %v974_v40 = vpop.f32.mrb[0].mxu0  ;;  %v986_v41 = vpop.f32.mrb[0].mxu1 }
 0x194   : > { %v439_v42 = vmul.f32 2.0, %v974_v40  ;;  %v447_v43 = vmul.f32 2.0, %v986_v41  ;;  %v359_v44 = vpop.f32.mrb[1].mxu0  ;;  %v399_v45 = vpop.f32.mrb[1].mxu1 }
 0x195   : > { %v438_v46 = vmul.f32 2.0, %v359_v44  ;;  %v446_v47 = vmul.f32 2.0, %v399_v45 }
 0x196   : > { %456 = vst.msk [vmem:[#allocation2 + $0x8] sm:$0xff] %vm454_vm0, %v439_v42  ;;  %464 = vst.msk [vmem:[#allocation2 + $0x48] sm:$0xff] %vm454_vm0, %v447_v43 }
 0x197   : > { %455 = vst.msk [vmem:[#allocation2] sm:$0xff] %vm454_vm0, %v438_v46  ;;  %463 = vst.msk [vmem:[#allocation2 + $0x40] sm:$0xff] %vm454_vm0, %v446_v47  ;;  %v977_v48 = vpop.f32.mrb[2].mxu0  ;;  %v989_v49 = vpop.f32.mrb[2].mxu1 }
 0x198   : > { %v441_v50 = vmul.f32 2.0, %v977_v48  ;;  %v449_v51 = vmul.f32 2.0, %v989_v49  ;;  %v369_v52 = vpop.f32.mrb[3].mxu0  ;;  %v409_v53 = vpop.f32.mrb[3].mxu1 }
 0x199   : > { %v440_v54 = vmul.f32 2.0, %v369_v52  ;;  %v448_v55 = vmul.f32 2.0, %v409_v53 }
 0x19a   : > { %458 = vst.msk [vmem:[#allocation2 + $0x18] sm:$0xff] %vm454_vm0, %v441_v50  ;;  %466 = vst.msk [vmem:[#allocation2 + $0x58] sm:$0xff] %vm454_vm0, %v449_v51 }
 0x19b   : > { %457 = vst.msk [vmem:[#allocation2 + $0x10] sm:$0xff] %vm454_vm0, %v440_v54  ;;  %465 = vst.msk [vmem:[#allocation2 + $0x50] sm:$0xff] %vm454_vm0, %v448_v55  ;;  %v980_v56 = vpop.f32.mrb[4].mxu0  ;;  %v992_v57 = vpop.f32.mrb[4].mxu1 }
 0x19c   : > { %v443_v58 = vmul.f32 2.0, %v980_v56  ;;  %v451_v59 = vmul.f32 2.0, %v992_v57  ;;  %v379_v60 = vpop.f32.mrb[5].mxu0  ;;  %v419_v61 = vpop.f32.mrb[5].mxu1 }
 0x19d   : > { %v442_v62 = vmul.f32 2.0, %v379_v60  ;;  %v450_v63 = vmul.f32 2.0, %v419_v61 }
 0x19e   : > { %460 = vst.msk [vmem:[#allocation2 + $0x28] sm:$0xff] %vm454_vm0, %v443_v58  ;;  %468 = vst.msk [vmem:[#allocation2 + $0x68] sm:$0xff] %vm454_vm0, %v451_v59 }
 0x19f   : > { %459 = vst.msk [vmem:[#allocation2 + $0x20] sm:$0xff] %vm454_vm0, %v442_v62  ;;  %467 = vst.msk [vmem:[#allocation2 + $0x60] sm:$0xff] %vm454_vm0, %v450_v63  ;;  %v983_v0 = vpop.f32.mrb[6].mxu0  ;;  %v995_v1 = vpop.f32.mrb[6].mxu1 }
 0x1a0   : > { %v445_v2 = vmul.f32 2.0, %v983_v0  ;;  %v453_v3 = vmul.f32 2.0, %v995_v1  ;;  %v389_v4 = vpop.f32.mrb[7].mxu0  ;;  %v429_v5 = vpop.f32.mrb[7].mxu1 }
 0x1a1   : > { %v444_v6 = vmul.f32 2.0, %v389_v4  ;;  %v452_v7 = vmul.f32 2.0, %v429_v5 }
 0x1a2   : > { %462 = vst.msk [vmem:[#allocation2 + $0x38] sm:$0xff] %vm454_vm0, %v445_v2  ;;  %470 = vst.msk [vmem:[#allocation2 + $0x78] sm:$0xff] %vm454_vm0, %v453_v3 }
 0x1a3   : > { %461 = vst.msk [vmem:[#allocation2 + $0x30] sm:$0xff] %vm454_vm0, %v444_v6  ;;  %469 = vst.msk [vmem:[#allocation2 + $0x70] sm:$0xff] %vm454_vm0, %v452_v7 }
 0x1a4 PF: > { %v488_v8 = vld [vmem:[%s225_s18 + $0x8] sm:$0xff]  ;;  %v487_v9 = vld [vmem:[%s225_s18] sm:$0xff]  ;;  %vm489_vm1 = vcmask 64512   ;;  %v1443_v12 = vmov 0.0   ;;  %s1992_s15 = sld [smem:[#allocation16_spill]]  ;;  %s1993_s4 = sld [smem:[#allocation17_spill]] }
 0x1a5   : > { %538 = vmatprep.subr.mxu0 %v488_v8  ;;  %1044 = vmatprep.subr.mxu1 %v488_v8  ;;  %v471_v10 = vld [vmem:[#allocation2] sm:$0xff]  ;;  %v472_v13 = vld [vmem:[#allocation2 + $0x8] sm:$0xff]  ;;  %v473_v15 = vld [vmem:[#allocation2 + $0x10] sm:$0xff]  ;;  %s748_s26 = sshll.u32 %s1761_s10, 4  ;;  %s1995_s1 = sld [smem:[#allocation18_spill]]  ;;  %s1852_s26 = int_to_ptr.vmem [resolvable:$true] %s748_s26 }
 0x1a6   : > { %v479_v11 = vld [vmem:[#allocation2 + $0x40] sm:$0xff]  ;;  %539 = vmatpush1.msra.mxu0 %v487_v9  ;;  %1045 = vmatpush1.msra.mxu1 %v487_v9  ;;  %v480_v14 = vld [vmem:[#allocation2 + $0x48] sm:$0xff]  ;;  %v481_v16 = vld [vmem:[#allocation2 + $0x50] sm:$0xff]  ;;  %s1996_s13 = sld [smem:[#allocation24_spill]]  ;;  %s1860_s30 = scalar_lea.sflag [#allocation5], %s250_s7 }
 0x1a7   : > { %602 = vmatprep.mubr.f32.mxu0 %v1443_v12  ;;  %650 = vmatprep.mubr.f32.mxu1 %v1443_v12  ;;  %v474_v17 = vld [vmem:[#allocation2 + $0x18] sm:$0xff]  ;;  %v475_v19 = vld [vmem:[#allocation2 + $0x20] sm:$0xff]  ;;  %v476_v21 = vld [vmem:[#allocation2 + $0x28] sm:$0xff]  ;;  %s1282_s0 = scalar_lea.vmem %s1852_s26, 4096  ;;  %s1444_s8 = smov [#allocation9]  }
 0x1a8   : > { %882 = vmatmul.mubr.msk.f32.vlgmr.msra.gmra.mrb[0].mxu0 %vm489_vm1, %v471_v10  ;;  %890 = vmatmul.mubr.msk.f32.vlgmr.msra.gmra.mrb[0].mxu1 %vm489_vm1, %v479_v11  ;;  %v482_v18 = vld [vmem:[#allocation2 + $0x58] sm:$0xff]  ;;  %v483_v20 = vld [vmem:[#allocation2 + $0x60] sm:$0xff]  ;;  %v484_v22 = vld [vmem:[#allocation2 + $0x68] sm:$0xff]  ;;  %p1283_p12 = scmp.ne.s32.totalorder %s1852_s26, %s1282_s0 }
 0x1a9   : > { %608 = vmatprep.mubr.f32.mxu0 %v1443_v12  ;;  %656 = vmatprep.mubr.f32.mxu1 %v1443_v12  ;;  %v478_v25 = vld [vmem:[#allocation2 + $0x38] sm:$0xff] }
 0x1aa   : > { %v477_v23 = vld [vmem:[#allocation2 + $0x30] sm:$0xff]  ;;  %v486_v26 = vld [vmem:[#allocation2 + $0x78] sm:$0xff]  ;;  %s900_s9 = sshll.u32 %s1992_s15, 1  ;;  %s907_s29 = sshll.u32 %s1993_s4, 6 }
 0x1ab   : > { %v485_v24 = vld [vmem:[#allocation2 + $0x70] sm:$0xff]  ;;  %s745_s5 = sadd.s32 %s907_s29, %s900_s9  ;;  %p1998_p0 = scmp.ne.s32.totalorder %s1995_s1, 0 }
 0x1ac   : > { %883 = vmatmul.mubr.msk.f32.gmra.mrb[2].mxu0 %vm489_vm1, %v472_v13  ;;  %891 = vmatmul.mubr.msk.f32.gmra.mrb[2].mxu1 %vm489_vm1, %v480_v14  ;;  %s902_s28 = sshll.u32 %s745_s5, 7  ;;  %s1997_s11 = smov %s1996_s13 }
 0x1ad   : > { %614 = vmatprep.mubr.f32.mxu0 %v1443_v12  ;;  %662 = vmatprep.mubr.f32.mxu1 %v1443_v12  ;;  %s1850_s18 = scalar_lea.hbm %s1996_s13, %s902_s28  ;;  %p1284_p4 = pnand %p1283_p12, %p1998_p0 }
 0x1ae   : > { %s1286_s15 = sshll.u32 %s1444_s8, 4  ;;  %s1287_s15 = int_to_ptr.vmem [resolvable:$false] %s1286_s15 }
 0x1af   : > { %p1285_p5 = pneg %p1284_p4  ;;  %s1288_s4 = scalar_lea.vmem %s1287_s15, 8192 }
 0x1b0   : > { %884 = vmatmul.mubr.msk.f32.gmra.mrb[4].mxu0 %vm489_vm1, %v473_v15  ;;  %892 = vmatmul.mubr.msk.f32.gmra.mrb[4].mxu1 %vm489_vm1, %v481_v16  ;;  %p1289_p11 = scmp.lt.s32.totalorder %s1852_s26, %s1287_s15  ;;  %p1290_p6 = scmp.lt.s32.totalorder %s1288_s4, %s1282_s0 }
 0x1b1   : > { %620 = vmatprep.mubr.f32.mxu0 %v1443_v12  ;;  %668 = vmatprep.mubr.f32.mxu1 %v1443_v12 }
 0x1b2   : > { %p1291_p2 = por %p1290_p6, %p1289_p11 }
 0x1b4   : > { %885 = vmatmul.mubr.msk.f32.gmra.mrb[6].mxu0 %vm489_vm1, %v474_v17  ;;  %893 = vmatmul.mubr.msk.f32.gmra.mrb[6].mxu1 %vm489_vm1, %v482_v18  ;;  %p1292_p9 = pnand %p1291_p2, %p1285_p5 }
 0x1b5   : > { %626 = vmatprep.mubr.f32.mxu0 %v1443_v12  ;;  %674 = vmatprep.mubr.f32.mxu1 %v1443_v12 }
 0x1b8   : > { %886 = vmatmul.mubr.msk.f32.gmra.mrb[8].mxu0 %vm489_vm1, %v475_v19  ;;  %894 = vmatmul.mubr.msk.f32.gmra.mrb[8].mxu1 %vm489_vm1, %v483_v20 }
 0x1b9   : > { %632 = vmatprep.mubr.f32.mxu0 %v1443_v12  ;;  %680 = vmatprep.mubr.f32.mxu1 %v1443_v12 }
 0x1bc   : > { %887 = vmatmul.mubr.msk.f32.gmra.mrb[10].mxu0 %vm489_vm1, %v476_v21  ;;  %895 = vmatmul.mubr.msk.f32.gmra.mrb[10].mxu1 %vm489_vm1, %v484_v22 }
 0x1bd   : > { %638 = vmatprep.mubr.f32.mxu0 %v1443_v12  ;;  %686 = vmatprep.mubr.f32.mxu1 %v1443_v12 }
 0x1c0   : > { %888 = vmatmul.mubr.msk.f32.gmra.mrb[12].mxu0 %vm489_vm1, %v477_v23  ;;  %896 = vmatmul.mubr.msk.f32.gmra.mrb[12].mxu1 %vm489_vm1, %v485_v24 }
 0x1c1   : > { %644 = vmatprep.mubr.f32.mxu0 %v1443_v12  ;;  %692 = vmatprep.mubr.f32.mxu1 %v1443_v12 }
 0x1c4   : > { %889 = vmatmul.mubr.msk.f32.gmra.mrb[14].mxu0 %vm489_vm1, %v478_v25  ;;  %897 = vmatmul.mubr.msk.f32.gmra.mrb[14].mxu1 %vm489_vm1, %v486_v26 }
 0x27b   : > { %v604_v27 = vpop.f32.mrb[0].mxu0  ;;  %v652_v28 = vpop.f32.mrb[0].mxu1 }
 0x27c   : > { %699 = vst [vmem:[%s1761_s10] sm:$0xff] %v604_v27  ;;  %715 = vst [vmem:[%s1761_s10 + $0x80] sm:$0xff] %v652_v28  ;;  %v606_v29 = vpop.f32.mrb[1].mxu0  ;;  %v654_v30 = vpop.f32.mrb[1].mxu1 }
 0x27d   : > { %700 = vst [vmem:[%s1761_s10 + $0x8] sm:$0xff] %v606_v29  ;;  %716 = vst [vmem:[%s1761_s10 + $0x88] sm:$0xff] %v654_v30 }
 0x27f   : > { %v610_v31 = vpop.f32.mrb[2].mxu0  ;;  %v658_v32 = vpop.f32.mrb[2].mxu1 }
 0x280   : > { %701 = vst [vmem:[%s1761_s10 + $0x10] sm:$0xff] %v610_v31  ;;  %717 = vst [vmem:[%s1761_s10 + $0x90] sm:$0xff] %v658_v32  ;;  %v612_v33 = vpop.f32.mrb[3].mxu0  ;;  %v660_v34 = vpop.f32.mrb[3].mxu1 }
 0x281   : > { %702 = vst [vmem:[%s1761_s10 + $0x18] sm:$0xff] %v612_v33  ;;  %718 = vst [vmem:[%s1761_s10 + $0x98] sm:$0xff] %v660_v34 }
 0x283   : > { %v616_v35 = vpop.f32.mrb[4].mxu0  ;;  %v664_v36 = vpop.f32.mrb[4].mxu1 }
 0x284   : > { %703 = vst [vmem:[%s1761_s10 + $0x20] sm:$0xff] %v616_v35  ;;  %719 = vst [vmem:[%s1761_s10 + $0xa0] sm:$0xff] %v664_v36  ;;  %v618_v37 = vpop.f32.mrb[5].mxu0  ;;  %v666_v38 = vpop.f32.mrb[5].mxu1 }
 0x285   : > { %704 = vst [vmem:[%s1761_s10 + $0x28] sm:$0xff] %v618_v37  ;;  %720 = vst [vmem:[%s1761_s10 + $0xa8] sm:$0xff] %v666_v38 }
 0x287   : > { %v622_v39 = vpop.f32.mrb[6].mxu0  ;;  %v670_v40 = vpop.f32.mrb[6].mxu1 }
 0x288   : > { %705 = vst [vmem:[%s1761_s10 + $0x30] sm:$0xff] %v622_v39  ;;  %721 = vst [vmem:[%s1761_s10 + $0xb0] sm:$0xff] %v670_v40  ;;  %v624_v41 = vpop.f32.mrb[7].mxu0  ;;  %v672_v42 = vpop.f32.mrb[7].mxu1 }
 0x289   : > { %706 = vst [vmem:[%s1761_s10 + $0x38] sm:$0xff] %v624_v41  ;;  %722 = vst [vmem:[%s1761_s10 + $0xb8] sm:$0xff] %v672_v42 }
 0x28b   : > { %v628_v43 = vpop.f32.mrb[8].mxu0  ;;  %v676_v44 = vpop.f32.mrb[8].mxu1 }
 0x28c   : > { %707 = vst [vmem:[%s1761_s10 + $0x40] sm:$0xff] %v628_v43  ;;  %723 = vst [vmem:[%s1761_s10 + $0xc0] sm:$0xff] %v676_v44  ;;  %v630_v45 = vpop.f32.mrb[9].mxu0  ;;  %v678_v46 = vpop.f32.mrb[9].mxu1 }
 0x28d   : > { %708 = vst [vmem:[%s1761_s10 + $0x48] sm:$0xff] %v630_v45  ;;  %724 = vst [vmem:[%s1761_s10 + $0xc8] sm:$0xff] %v678_v46 }
 0x28f   : > { %v634_v47 = vpop.f32.mrb[10].mxu0  ;;  %v682_v48 = vpop.f32.mrb[10].mxu1 }
 0x290   : > { %709 = vst [vmem:[%s1761_s10 + $0x50] sm:$0xff] %v634_v47  ;;  %725 = vst [vmem:[%s1761_s10 + $0xd0] sm:$0xff] %v682_v48  ;;  %v636_v49 = vpop.f32.mrb[11].mxu0  ;;  %v684_v50 = vpop.f32.mrb[11].mxu1 }
 0x291   : > { %710 = vst [vmem:[%s1761_s10 + $0x58] sm:$0xff] %v636_v49  ;;  %726 = vst [vmem:[%s1761_s10 + $0xd8] sm:$0xff] %v684_v50 }
 0x293   : > { %v640_v51 = vpop.f32.mrb[12].mxu0  ;;  %v688_v52 = vpop.f32.mrb[12].mxu1 }
 0x294   : > { %711 = vst [vmem:[%s1761_s10 + $0x60] sm:$0xff] %v640_v51  ;;  %727 = vst [vmem:[%s1761_s10 + $0xe0] sm:$0xff] %v688_v52  ;;  %v642_v53 = vpop.f32.mrb[13].mxu0  ;;  %v690_v54 = vpop.f32.mrb[13].mxu1 }
 0x295   : > { %712 = vst [vmem:[%s1761_s10 + $0x68] sm:$0xff] %v642_v53  ;;  %728 = vst [vmem:[%s1761_s10 + $0xe8] sm:$0xff] %v690_v54 }
 0x297   : > { %v646_v55 = vpop.f32.mrb[14].mxu0  ;;  %v694_v56 = vpop.f32.mrb[14].mxu1 }
 0x298   : > { %713 = vst [vmem:[%s1761_s10 + $0x70] sm:$0xff] %v646_v55  ;;  %729 = vst [vmem:[%s1761_s10 + $0xf0] sm:$0xff] %v694_v56  ;;  %v648_v57 = vpop.f32.mrb[15].mxu0  ;;  %v696_v58 = vpop.f32.mrb[15].mxu1 }
 0x299   : > { %714 = vst [vmem:[%s1761_s10 + $0x78] sm:$0xff] %v648_v57  ;;  %730 = vst [vmem:[%s1761_s10 + $0xf8] sm:$0xff] %v696_v58 }
 0x29a   : > { %1295 = shalt.err (!%p1292_p9)
}
 0x29b   : > { %s1296_s7 = scalar_lea.hbm %s1850_s18, 4096  ;;  %s1300_s29 = scalar_lea.hbm %s1997_s11, 16384 }
 0x29c   : > { %p1297_p10 = scmp.ne.s32.totalorder %s1850_s18, %s1296_s7  ;;  %p1301_p3 = scmp.lt.u32.totalorder %s1850_s18, %s1997_s11 }
 0x29d   : > { %p1302_p7 = scmp.lt.u32.totalorder %s1300_s29, %s1296_s7  ;;  %p1304_p12 = scmp.lt.u32.totalorder %s1296_s7, %s1850_s18 }
 0x29e   : > { %p1298_p13 = pnand %p1297_p10, %p1998_p0 }
 0x29f   : > { %p1303_p8 = por %p1302_p7, %p1301_p3 }
 0x2a0   : > { %p1299_p1 = pneg %p1298_p13 }
 0x2a1   : > { %p1305_p4 = por %p1304_p12, %p1303_p8 }
 0x2a3   : > { %p1306_p5 = pnand %p1305_p4, %p1299_p1 }
 0x2a5   : > { %1309 = shalt.err (!%p1306_p5)
}
 0x2a6   : > { %s1445_s6 = smov 256   ;;  %s1446_s21 = smov 512  }
 0x2a7   : > { %s1447_s22 = smov 16  }
 0x2a8   : > { %1054 = dma.vmem_to_hbm [thread:$0]  (%p1998_p0), %s1852_s26, 4096, %s1850_s18, %s1860_s30, %s1445_s6, %s1446_s21, %s1447_s22  }
 0x2a9 PF: > { %s1999_s13 = sld [smem:[#allocation14_spill]]  ;;  %s2000_s0 = sld [smem:[#allocation19_spill]] }
 0x2aa   : > { %p1074_p11 = scmp.ge.s32.totalorder %s1436_s25, 2 }
 0x2af   : > { %s763_s8 = sand.u32 1, %s1999_s13   ;;  %p2001_p6 = scmp.ne.s32.totalorder %s2000_s0, 0 }
 0x2b0   : > { %s764_s15 = scalar_lea.sflag [#allocation5], %s763_s8 }
 0x2b1   : > { %p1068_p2 = pnand %p1074_p11, %p2001_p6 }
 0x2b3   : > { %1379 = dma.done.wait (!%p1068_p2), %s764_s15, 4096  }
 0x2b4   : > { %1381 = vsyncadd (!%p1068_p2), %s764_s15, 4294963200  ;;  %s20_s25 = sadd.s32 1, %s1436_s25   ;;  %s2003_s7 = sld [smem:[#allocation15_spill]] }
 0x2b5   : > { %p1889_p9 = scmp.ge.s32.totalorder %s20_s25, 6   ;;  %s2004_s26 = smov %s1689_s12 }
 0x2b6   : > { %s2005_s1 = sld [smem:[#allocation20_spill]]  ;;  %s2006_s30 = sld [smem:[#allocation21_spill]] }
 0x2b7   : > { %s2008_s13 = smov %s1392_s14  ;;  %s2009_s14 = smov %s1692_s3 }
 0x2b8   : > { %s2010_s15 = smov %s1400_s16  ;;  %s2011_s16 = smov %s1404_s17 }
 0x2b9   : > { %s2012_s17 = smov %s1681_s27  ;;  %s2013_s18 = smov %s1412_s19 }
 0x2ba   : > { %s2007_s12 = smov %s2003_s7  ;;  %s2014_s19 = smov %s1416_s20 }
 0x2bb   : > { %s2015_s20 = smov %s2004_s26  ;;  %s2016_s21 = smov %s1428_s23 }
 0x2bc   : > { %s2017_s22 = smov %s1432_s24  ;;  %s2018_s23 = smov %s2005_s1 }
 0x2bd   : > { %s2019_s24 = smov %s2006_s30  ;;  %19 = sbr.rel (!%p1889_p9) target bundleno = 15 (0xf), region = 96 }
 0x2c4   :  { %769 = vsyncpa [#allocation4], 1 }
 0x2c5   :  { %771 = vsyncpa [#allocation4 + $0x1], 1 }
 0x2c6   :  { %772 = vsyncpa [#allocation7], 1 }
 0x2c7   :  { %773 = vsyncpa [#allocation5], 1 }
 0x2c8   :  { %775 = vsyncpa [#allocation5 + $0x1], 1 }

</bundles_post_ra>
